<compile_context>
chip_gen: v6e
topology: v6e:2x2x1
jax: 0.10.0
libtpu: 0.0.40
codegen_flags: <defaults>
</compile_context>

<pallas_src>
import functools

import jax
import jax.numpy as jnp
from jax import lax
from jax.experimental import pallas as pl
from jax.experimental.pallas import tpu as pltpu


def default_postprocess_script(x):
    return x


def _round_up(x, k):
    return ((x + k - 1) // k) * k


def _sublane_min(dtype):
    # Minimum sublane tile per element width (f32: 8, bf16: 16, int8/fp8: 32).
    return {4: 8, 2: 16, 1: 32}.get(jnp.dtype(dtype).itemsize, 8)


# ----------------------------------------------------------------------------
# Pallas kernels
# ----------------------------------------------------------------------------
def _sq_dist_single_k_kernel(x1_ref, x2_ref, o_ref, *, square_dist):
    # Full feature dim in one block: dot + epilogue straight into o_ref.
    res = lax.dot_general(
        x1_ref[...], x2_ref[...],
        dimension_numbers=(((1,), (1,)), ((), ())),      # NT matmul, no .T
        preferred_element_type=jnp.float32)
    res = jnp.maximum(res, 0.0)                          # res.clamp_min_(0)
    if not square_dist:
        res = jnp.sqrt(jnp.maximum(res, 1e-30))          # clamp_min_(1e-30).sqrt_()
    o_ref[...] = res.astype(o_ref.dtype)


def _sq_dist_multi_k_kernel(x1_ref, x2_ref, o_ref, acc_ref, *, square_dist):
    # Grid = (n-tiles, m-tiles, k-tiles); k (reduction) last, "arbitrary".
    @pl.when(pl.program_id(2) == 0)
    def _():
        acc_ref[...] = jnp.zeros_like(acc_ref)

    acc_ref[...] += lax.dot_general(
        x1_ref[...], x2_ref[...],
        dimension_numbers=(((1,), (1,)), ((), ())),
        preferred_element_type=jnp.float32)

    @pl.when(pl.program_id(2) == pl.num_programs(2) - 1)
    def _():
        res = jnp.maximum(acc_ref[...], 0.0)
        if not square_dist:
            res = jnp.sqrt(jnp.maximum(res, 1e-30))
        o_ref[...] = res.astype(o_ref.dtype)


def _diag_dist_kernel(x1_ref, x2_ref, o_ref, *, square_dist):
    # Natural (rows, d) layout; cross-lane reduce over the feature dim (XLU).
    diff = (x1_ref[...] - x2_ref[...]).astype(jnp.float32)
    sq = jnp.sum(diff * diff, axis=-1, keepdims=True)    # (rows, 1)
    res = sq if square_dist else jnp.sqrt(sq)
    o_ref[...] = res.astype(o_ref.dtype)


# ----------------------------------------------------------------------------
# Python wrapper (mirrors Kernel.covar_dist semantics)
# ----------------------------------------------------------------------------
def covar_dist(x1, x2, *, diag=False, last_dim_is_batch=False,
               square_dist=True, x1_eq_x2=None,
               dist_postprocess_func=default_postprocess_script,
               postprocess=True,
               tm=512, tn=512, tk=512):
    if last_dim_is_batch:
        # TODO(synk): last_dim_is_batch (per-feature 1-d batched) path not lowered.
        raise NotImplementedError("last_dim_is_batch not supported")

    n, d = x1.shape
    m, d2 = x2.shape
    assert d == d2

    def _post(res):
        return dist_postprocess_func(res) if postprocess else res

    # ---------------------------- diag path ---------------------------------
    if diag:
        if x1_eq_x2 is None:
            # Identity check only: no device->host sync, jit-safe.  Value-equal
            # but distinct inputs fall through to the norm path, which yields
            # exact zeros anyway (diff == 0), so semantics match the spec.
            x1_eq_x2 = x1 is x2
        if x1_eq_x2:
            return _post(jnp.zeros((n,), dtype=x1.dtype))

        sub = _sublane_min(x1.dtype)
        itemsize = jnp.dtype(x1.dtype).itemsize
        # Keep the two double-buffered (rows, d) input blocks within ~8 MiB.
        rows_cap = (8 * 1024 * 1024) // (4 * d * itemsize)
        rows_cap = max(sub, (rows_cap // sub) * sub)
        bn_rows = min(1024, rows_cap, _round_up(n, sub))

        kern = functools.partial(_diag_dist_kernel, square_dist=square_dist)
        out = pl.pallas_call(
            kern,
            grid_spec=pltpu.PrefetchScalarGridSpec(
                num_scalar_prefetch=0,
                grid=(pl.cdiv(n, bn_rows),),
                in_specs=[pl.BlockSpec((bn_rows, d), lambda i: (i, 0)),
                          pl.BlockSpec((bn_rows, d), lambda i: (i, 0))],
                out_specs=pl.BlockSpec((bn_rows, 1), lambda i: (i, 0)),
            ),
            out_shape=jax.ShapeDtypeStruct((n, 1), x1.dtype),
            compiler_params=pltpu.CompilerParams(
                dimension_semantics=("parallel",)),
        )(x1, x2)
        return _post(out[:, 0])

    # ------------------------ full kernel-matrix path -----------------------
    # MXU-aligned tile clamps (multiples of 256 feed the 256-wide MXU on
    # v6e/v7x; 256 is also a multiple of 128 for v5e and of every dtype's
    # sublane minimum).  Ragged n/m ride a cdiv grid: partial edge blocks
    # contain garbage only in rows/cols that the output writeback clips.
    bm = min(tm, _round_up(n, 256))
    bn = min(tn, _round_up(m, 256))
    grid_ij = (pl.cdiv(n, bm), pl.cdiv(m, bn))
    # NOTE(v7x megacore): both i and j axes are "parallel"; very small problems
    # (single output tile) leave one TensorCore idle — acceptable here.

    if d <= tk:
        # Single K step: no accumulator scratch, no K grid axis, no padding.
        kern = functools.partial(_sq_dist_single_k_kernel,
                                 square_dist=square_dist)
        out = pl.pallas_call(
            kern,
            grid_spec=pltpu.PrefetchScalarGridSpec(
                num_scalar_prefetch=0,
                grid=grid_ij,
                in_specs=[pl.BlockSpec((bm, d), lambda i, j: (i, 0)),
                          pl.BlockSpec((bn, d), lambda i, j: (j, 0))],
                out_specs=pl.BlockSpec((bm, bn), lambda i, j: (i, j)),
            ),
            out_shape=jax.ShapeDtypeStruct((n, m), x1.dtype),
            compiler_params=pltpu.CompilerParams(
                dimension_semantics=("parallel", "parallel")),
        )(x1, x2)
        return _post(out)

    # Large feature dim: tile K with an f32 VMEM accumulator.  Only the
    # contraction dim is zero-padded (required for correctness); n/m are not.
    bk = tk
    d_pad = _round_up(d, bk)
    x1k = jnp.pad(x1, ((0, 0), (0, d_pad - d))) if d_pad != d else x1
    x2k = jnp.pad(x2, ((0, 0), (0, d_pad - d))) if d_pad != d else x2

    kern = functools.partial(_sq_dist_multi_k_kernel, square_dist=square_dist)
    out = pl.pallas_call(
        kern,
        grid_spec=pltpu.PrefetchScalarGridSpec(
            num_scalar_prefetch=0,
            grid=grid_ij + (d_pad // bk,),
            in_specs=[pl.BlockSpec((bm, bk), lambda i, j, k: (i, k)),
                      pl.BlockSpec((bn, bk), lambda i, j, k: (j, k))],
            out_specs=pl.BlockSpec((bm, bn), lambda i, j, k: (i, j)),
            scratch_shapes=[pltpu.VMEM((bm, bn), jnp.float32)],
        ),
        out_shape=jax.ShapeDtypeStruct((n, m), x1.dtype),
        compiler_params=pltpu.CompilerParams(
            dimension_semantics=("parallel", "parallel", "arbitrary")),
    )(x1k, x2k)
    return _post(out)


# ----------------------------------------------------------------------------
# Reference (plain JAX) for validation — same semantics as the spec module.
# ----------------------------------------------------------------------------
def _ref_covar_dist(x1, x2, *, diag=False, square_dist=True, x1_eq_x2=False):
    if diag:
        if x1_eq_x2:
            return jnp.zeros((x1.shape[0],), x1.dtype)
        r = jnp.linalg.norm(x1.astype(jnp.float32) - x2.astype(jnp.float32),
                            axis=-1)
        return (r ** 2 if square_dist else r).astype(x1.dtype)
    res = jnp.maximum(
        jnp.dot(x1.astype(jnp.float32), x2.astype(jnp.float32).T), 0.0)
    if not square_dist:
        res = jnp.sqrt(jnp.maximum(res, 1e-30))
    return res.astype(x1.dtype)


if __name__ == "__main__":
    key = jax.random.PRNGKey(0)
    k1, k2, k3, k4, k5, k6 = jax.random.split(key, 6)

    # --- small case (single tile each way) -----------------------------------
    n, m, dfeat = 16, 16, 32
    x1 = jax.random.normal(k1, (n, dfeat), dtype=jnp.float32)
    x2 = jax.random.normal(k2, (m, dfeat), dtype=jnp.float32)

    out_sq = covar_dist(x1, x2, square_dist=True)
    jax.block_until_ready(out_sq)
    out_d = covar_dist(x1, x2, square_dist=False)
    out_diag = covar_dist(x1, x2, diag=True, square_dist=True)
    out_diag_d = covar_dist(x1, x2, diag=True, square_dist=False)
    out_diag0 = covar_dist(x1, x1, diag=True, square_dist=True)
    jax.block_until_ready((out_d, out_diag, out_diag_d, out_diag0))

    assert jnp.allclose(out_sq, _ref_covar_dist(x1, x2, square_dist=True),
                        atol=1e-4, rtol=1e-4)
    assert jnp.allclose(out_d, _ref_covar_dist(x1, x2, square_dist=False),
                        atol=1e-4, rtol=1e-4)
    assert jnp.allclose(out_diag, _ref_covar_dist(x1, x2, diag=True),
                        atol=1e-4, rtol=1e-4)
    assert jnp.allclose(out_diag_d,
                        _ref_covar_dist(x1, x2, diag=True, square_dist=False),
                        atol=1e-4, rtol=1e-4)
    assert jnp.allclose(out_diag0, jnp.zeros((n,), jnp.float32))

    # --- moderate ragged case: partial edge blocks, no host-side padding -----
    n2, m2, d2 = 384, 200, 72
    y1 = jax.random.normal(k3, (n2, d2), dtype=jnp.float32)
    y2 = jax.random.normal(k4, (m2, d2), dtype=jnp.float32)

    out2 = covar_dist(y1, y2, square_dist=True)
    jax.block_until_ready(out2)
    assert out2.shape == (n2, m2)
    assert jnp.allclose(out2, _ref_covar_dist(y1, y2, square_dist=True),
                        atol=1e-3, rtol=1e-3)

    out2d = covar_dist(y1, y1[:n2], diag=True, square_dist=False,
                       x1_eq_x2=False)
    jax.block_until_ready(out2d)
    assert out2d.shape == (n2,)
    assert jnp.allclose(out2d,
                        _ref_covar_dist(y1, y1, diag=True, square_dist=False),
                        atol=1e-3, rtol=1e-3)

    # --- large-d case: exercises the K-tiled (multi-step reduction) kernel ---
    n3, m3, d3 = 40, 24, 640
    z1 = jax.random.normal(k5, (n3, d3), dtype=jnp.float32)
    z2 = jax.random.normal(k6, (m3, d3), dtype=jnp.float32)
    out3 = covar_dist(z1, z2, square_dist=False)
    jax.block_until_ready(out3)
    assert out3.shape == (n3, m3)
    assert jnp.allclose(out3, _ref_covar_dist(z1, z2, square_dist=False),
                        atol=1e-3, rtol=1e-3)

    print("KERNEL_OK")
</pallas_src>

<mosaic_0001>
module attributes {stable_mosaic.version = 11 : i64} {
  func.func @_sq_dist_single_k_kernel(%arg0: i32, %arg1: i32, %arg2: memref<256x32xf32, #tpu.memory_space<vmem>>, %arg3: memref<256x32xf32, #tpu.memory_space<vmem>>, %arg4: memref<256x256xf32, #tpu.memory_space<vmem>>) attributes {dimension_semantics = [#tpu.dimension_semantics<parallel>, #tpu.dimension_semantics<parallel>], iteration_bounds = array<i64: 1, 1>, scalar_prefetch = 0 : i64, scratch_operands = 0 : i64, tpu.core_type = #tpu.core_type<tc>, window_params = [{transform_indices = @transform_0, window_bounds = array<i64: 256, 32>}, {transform_indices = @transform_1, window_bounds = array<i64: 256, 32>}, {transform_indices = @transform_2, window_bounds = array<i64: 256, 256>}]} {
    %c0 = arith.constant 0 : index
    %c0_0 = arith.constant 0 : index
    %0 = vector.load %arg2[%c0, %c0_0] : memref<256x32xf32, #tpu.memory_space<vmem>>, vector<256x32xf32>
    %c0_1 = arith.constant 0 : index
    %c0_2 = arith.constant 0 : index
    %1 = vector.load %arg3[%c0_1, %c0_2] : memref<256x32xf32, #tpu.memory_space<vmem>>, vector<256x32xf32>
    %cst = arith.constant dense<0.000000e+00> : vector<256x256xf32>
    %2 = tpu.matmul %0, %1, %cst {dimension_numbers = #tpu.dot_dimension_numbers<[1], [1], [0], [0], [0, 0, 1, 0], [], []>} : vector<256x32xf32>, vector<256x32xf32>, vector<256x256xf32> -> vector<256x256xf32>
    %cst_3 = arith.constant 0.000000e+00 : f32
    %3 = vector.broadcast %cst_3 : f32 to vector<256x256xf32>
    %4 = arith.maximumf %2, %3 : vector<256x256xf32>
    %c0_4 = arith.constant 0 : index
    %c0_5 = arith.constant 0 : index
    %5 = vector.load %arg4[%c0_4, %c0_5] : memref<256x256xf32, #tpu.memory_space<vmem>>, vector<256x256xf32>
    tpu.vector_store %arg4[%c0_4, %c0_5], %4 {strides = array<i32>} : memref<256x256xf32, #tpu.memory_space<vmem>>, vector<256x256xf32>,
    return
  }
  func.func @transform_0(%arg0: i32, %arg1: i32) -> (i32, i32) {
    %c0_i32 = arith.constant 0 : i32
    %c0_i32_0 = arith.constant 0 : i32
    return %arg0, %c0_i32 : i32, i32
  }
  func.func @transform_1(%arg0: i32, %arg1: i32) -> (i32, i32) {
    %c0_i32 = arith.constant 0 : i32
    %c0_i32_0 = arith.constant 0 : i32
    return %arg1, %c0_i32 : i32, i32
  }
  func.func @transform_2(%arg0: i32, %arg1: i32) -> (i32, i32) {
    %c0_i32 = arith.constant 0 : i32
    return %arg0, %arg1 : i32, i32
  }
}

</mosaic_0001>

<bundles_post_ra>
// kernel: tpu_custom_call.1
= control target key start
LH: loop header
LB: loop body
LE: loop exit
PB: predicated region body
PF: predicated region fallthrough
CT: control target
= control target key end

     0   :  { %7 = vsyncpa [#allocation3], 0  ;;  %s1138_s0 = inlined_call_operand.hbm [shape: f32[16,32], index: 0, kind: input, shape index: {}]   ;;  %s1139_s1 = inlined_call_operand.hbm [shape: f32[16,32], index: 1, kind: input, shape index: {}]   ;;  %s1140_s2 = inlined_call_operand.hbm [shape: f32[16,16], index: 2, kind: output, shape index: {}]  }
   0x1   :  { %8 = vsyncpa [#allocation6], 0 }
   0x2   :  { %9 = vsyncpa [#allocation4], 0 }
   0x3   :  { %14 = vsyncadd [#allocation3], 3840  ;;  %s964_s9 = smov [#allocation2]  }
   0x4   :  { %s15_s10 = sshll.u32 %s964_s9, 4  ;;  %s16_s10 = int_to_ptr.vmem [resolvable:$true] %s15_s10 }
   0x5   :  { %s906_s11 = scalar_lea.vmem %s16_s10, 256  ;;  %s910_s12 = scalar_lea.vmem %s16_s10, 4096 }
   0x6   :  { %p907_p0 = scmp.ne.s32.totalorder %s16_s10, %s906_s11  ;;  %p911_p1 = scmp.lt.s32.totalorder %s16_s10, %s16_s10 }
   0x7   :  { %p912_p2 = scmp.lt.s32.totalorder %s910_s12, %s906_s11 }
   0x9   :  { %p913_p3 = por %p912_p2, %p911_p1 }
   0xb   :  { %p914_p4 = pnand %p913_p3, %p907_p0 }
   0xd   :  { %917 = shalt.err (!%p914_p4)
}
   0xe   :  { %s965_s13 = smov 128   ;;  %s966_s14 = smov 8  }
   0xf   :  { %21 = dma.hbm_to_vmem [thread:$0]  %s1138_s0, 256, %s16_s10, [#allocation3], %s965_s13, %s965_s13, %s966_s14  }
  0x10   :  { %26 = vsyncadd [#allocation6], 3840  ;;  %s967_s17 = smov [#allocation5]  }
  0x11   :  { %s27_s18 = sshll.u32 %s967_s17, 4  ;;  %s28_s18 = int_to_ptr.vmem [resolvable:$true] %s27_s18 }
  0x12   :  { %s926_s19 = scalar_lea.vmem %s28_s18, 256  ;;  %s930_s20 = scalar_lea.vmem %s28_s18, 4096 }
  0x13   :  { %p927_p5 = scmp.ne.s32.totalorder %s28_s18, %s926_s19  ;;  %p931_p6 = scmp.lt.s32.totalorder %s28_s18, %s28_s18 }
  0x14   :  { %p932_p7 = scmp.lt.s32.totalorder %s930_s20, %s926_s19 }
  0x16   :  { %p933_p8 = por %p932_p7, %p931_p6 }
  0x18   :  { %p934_p9 = pnand %p933_p8, %p927_p5 }
  0x1a   :  { %937 = shalt.err (!%p934_p9)
}
  0x1b   :  { %33 = dma.hbm_to_vmem [thread:$0]  %s1139_s1, 256, %s28_s18, [#allocation6], %s965_s13, %s965_s13, %s966_s14  }
  0x1c   :  { %958 = dma.done.wait [#allocation3], 4096  }
  0x1d   :  { %959 = vsyncadd [#allocation3], 4294963200 }
  0x1e   :  { %960 = dma.done.wait [#allocation6], 4096  }
  0x1f   :  { %961 = vsyncadd [#allocation6], 4294963200  ;;  %vm104_vm0 = vcmask 261120   ;;  %v103_v0 = vld [vmem:[#allocation5 + $0xf8] sm:$0xff]  ;;  %v102_v2 = vld [vmem:[#allocation5 + $0xf0] sm:$0xff] }
  0x20   :  { %v87_v1 = vld [vmem:[#allocation5 + $0x78] sm:$0xff]  ;;  %764 = vmatprep.subr.msk.mxu0 %vm104_vm0, %v103_v0  ;;  %860 = vmatprep.subr.msk.mxu1 %vm104_vm0, %v103_v0  ;;  %v86_v3 = vld [vmem:[#allocation5 + $0x70] sm:$0xff]  ;;  %v101_v4 = vld [vmem:[#allocation5 + $0xe8] sm:$0xff] }
  0x21   :  { %765 = vmatpush3.xpose.msk.msra.mxu0 %vm104_vm0, %v87_v1  ;;  %876 = vmatpush3.xpose.msk.msra.mxu1 %vm104_vm0, %v87_v1  ;;  %v85_v5 = vld [vmem:[#allocation5 + $0x68] sm:$0xff]  ;;  %v100_v6 = vld [vmem:[#allocation5 + $0xe0] sm:$0xff]  ;;  %v99_v10 = vld [vmem:[#allocation5 + $0xd8] sm:$0xff] }
  0x22   :  { %766 = vmatprep.subr.msk.mxu0 %vm104_vm0, %v102_v2  ;;  %861 = vmatprep.subr.msk.mxu1 %vm104_vm0, %v102_v2  ;;  %v1009_v7 = vld [vmem:[#allocation2] sm:$0xff]  ;;  %v83_v11 = vld [vmem:[#allocation5 + $0x58] sm:$0xff]  ;;  %v98_v12 = vld [vmem:[#allocation5 + $0xd0] sm:$0xff] }
  0x23   :  { %v84_v8 = vld [vmem:[#allocation5 + $0x60] sm:$0xff]  ;;  %796 = vmatprep.mubr.msk.f32.mxu0 %vm104_vm0, %v1009_v7  ;;  %v82_v13 = vld [vmem:[#allocation5 + $0x50] sm:$0xff]  ;;  %v97_v14 = vld [vmem:[#allocation5 + $0xc8] sm:$0xff] }
  0x24   :  { %v1013_v9 = vld [vmem:[#allocation2 + $0x80] sm:$0xff]  ;;  %v81_v15 = vld [vmem:[#allocation5 + $0x48] sm:$0xff]  ;;  %v95_v18 = vld [vmem:[#allocation5 + $0xb8] sm:$0xff] }
  0x25   :  { %767 = vmatpush3.xpose.msk.msra.mxu0 %vm104_vm0, %v86_v3  ;;  %877 = vmatpush3.xpose.msk.msra.mxu1 %vm104_vm0, %v86_v3  ;;  %v96_v16 = vld [vmem:[#allocation5 + $0xc0] sm:$0xff]  ;;  %v79_v19 = vld [vmem:[#allocation5 + $0x38] sm:$0xff]  ;;  %v94_v20 = vld [vmem:[#allocation5 + $0xb0] sm:$0xff] }
  0x26   :  { %768 = vmatprep.subr.msk.mxu0 %vm104_vm0, %v101_v4  ;;  %862 = vmatprep.subr.msk.mxu1 %vm104_vm0, %v101_v4  ;;  %v80_v17 = vld [vmem:[#allocation5 + $0x40] sm:$0xff]  ;;  %v78_v21 = vld [vmem:[#allocation5 + $0x30] sm:$0xff]  ;;  %v93_v22 = vld [vmem:[#allocation5 + $0xa8] sm:$0xff] }
  0x27   :  { %828 = vmatprep.mubr.msk.f32.mxu1 %vm104_vm0, %v1013_v9  ;;  %v77_v23 = vld [vmem:[#allocation5 + $0x28] sm:$0xff]  ;;  %v92_v24 = vld [vmem:[#allocation5 + $0xa0] sm:$0xff]  ;;  %v91_v26 = vld [vmem:[#allocation5 + $0x98] sm:$0xff] }
  0x28   :  { %v76_v25 = vld [vmem:[#allocation5 + $0x20] sm:$0xff]  ;;  %v75_v27 = vld [vmem:[#allocation5 + $0x18] sm:$0xff]  ;;  %v90_v28 = vld [vmem:[#allocation5 + $0x90] sm:$0xff] }
  0x29   :  { %769 = vmatpush3.xpose.msk.msra.mxu0 %vm104_vm0, %v85_v5  ;;  %878 = vmatpush3.xpose.msk.msra.mxu1 %vm104_vm0, %v85_v5  ;;  %v74_v29 = vld [vmem:[#allocation5 + $0x10] sm:$0xff]  ;;  %v89_v30 = vld [vmem:[#allocation5 + $0x88] sm:$0xff]  ;;  %v88_v32 = vld [vmem:[#allocation5 + $0x80] sm:$0xff] }
  0x2a   :  { %770 = vmatprep.subr.msk.mxu0 %vm104_vm0, %v100_v6  ;;  %863 = vmatprep.subr.msk.mxu1 %vm104_vm0, %v100_v6  ;;  %v73_v31 = vld [vmem:[#allocation5 + $0x8] sm:$0xff]  ;;  %v72_v33 = vld [vmem:[#allocation5] sm:$0xff]  ;;  %v42_v36 = vld [vmem:[#allocation2 + $0x10] sm:$0xff] }
  0x2b   :  { %v41_v34 = vld [vmem:[#allocation2 + $0x8] sm:$0xff]  ;;  %v58_v37 = vld [vmem:[#allocation2 + $0x90] sm:$0xff]  ;;  %v43_v38 = vld [vmem:[#allocation2 + $0x18] sm:$0xff] }
  0x2c   :  { %v57_v35 = vld [vmem:[#allocation2 + $0x88] sm:$0xff]  ;;  %v59_v39 = vld [vmem:[#allocation2 + $0x98] sm:$0xff]  ;;  %v44_v40 = vld [vmem:[#allocation2 + $0x20] sm:$0xff] }
  0x2d   :  { %771 = vmatpush3.xpose.msk.msra.mxu0 %vm104_vm0, %v84_v8  ;;  %879 = vmatpush3.xpose.msk.msra.mxu1 %vm104_vm0, %v84_v8  ;;  %v60_v41 = vld [vmem:[#allocation2 + $0xa0] sm:$0xff]  ;;  %v45_v42 = vld [vmem:[#allocation2 + $0x28] sm:$0xff]  ;;  %v46_v44 = vld [vmem:[#allocation2 + $0x30] sm:$0xff] }
  0x2e   :  { %772 = vmatprep.subr.msk.mxu0 %vm104_vm0, %v99_v10  ;;  %864 = vmatprep.subr.msk.mxu1 %vm104_vm0, %v99_v10  ;;  %v61_v43 = vld [vmem:[#allocation2 + $0xa8] sm:$0xff]  ;;  %v62_v45 = vld [vmem:[#allocation2 + $0xb0] sm:$0xff]  ;;  %v47_v46 = vld [vmem:[#allocation2 + $0x38] sm:$0xff] }
  0x2f   :  { %v63_v47 = vld [vmem:[#allocation2 + $0xb8] sm:$0xff]  ;;  %v48_v48 = vld [vmem:[#allocation2 + $0x40] sm:$0xff]  ;;  %v49_v50 = vld [vmem:[#allocation2 + $0x48] sm:$0xff] }
  0x30   :  { %v64_v49 = vld [vmem:[#allocation2 + $0xc0] sm:$0xff]  ;;  %v65_v51 = vld [vmem:[#allocation2 + $0xc8] sm:$0xff]  ;;  %v50_v52 = vld [vmem:[#allocation2 + $0x50] sm:$0xff] }
  0x31   :  { %773 = vmatpush3.xpose.msk.msra.mxu0 %vm104_vm0, %v83_v11  ;;  %880 = vmatpush3.xpose.msk.msra.mxu1 %vm104_vm0, %v83_v11  ;;  %v66_v53 = vld [vmem:[#allocation2 + $0xd0] sm:$0xff]  ;;  %v51_v54 = vld [vmem:[#allocation2 + $0x58] sm:$0xff]  ;;  %v52_v56 = vld [vmem:[#allocation2 + $0x60] sm:$0xff] }
  0x32   :  { %774 = vmatprep.subr.msk.mxu0 %vm104_vm0, %v98_v12  ;;  %865 = vmatprep.subr.msk.mxu1 %vm104_vm0, %v98_v12  ;;  %v67_v55 = vld [vmem:[#allocation2 + $0xd8] sm:$0xff]  ;;  %v68_v57 = vld [vmem:[#allocation2 + $0xe0] sm:$0xff]  ;;  %v53_v58 = vld [vmem:[#allocation2 + $0x68] sm:$0xff] }
  0x33   :  { %v69_v59 = vld [vmem:[#allocation2 + $0xe8] sm:$0xff]  ;;  %v54_v60 = vld [vmem:[#allocation2 + $0x70] sm:$0xff]  ;;  %v55_v62 = vld [vmem:[#allocation2 + $0x78] sm:$0xff] }
  0x34   :  { %v70_v61 = vld [vmem:[#allocation2 + $0xf0] sm:$0xff]  ;;  %v71_v63 = vld [vmem:[#allocation2 + $0xf8] sm:$0xff] }
  0x35   :  { %775 = vmatpush3.xpose.msk.msra.mxu0 %vm104_vm0, %v82_v13  ;;  %881 = vmatpush3.xpose.msk.msra.mxu1 %vm104_vm0, %v82_v13 }
  0x36   :  { %776 = vmatprep.subr.msk.mxu0 %vm104_vm0, %v97_v14  ;;  %866 = vmatprep.subr.msk.mxu1 %vm104_vm0, %v97_v14 }
  0x39   :  { %777 = vmatpush3.xpose.msk.msra.mxu0 %vm104_vm0, %v81_v15  ;;  %882 = vmatpush3.xpose.msk.msra.mxu1 %vm104_vm0, %v81_v15 }
  0x3a   :  { %778 = vmatprep.subr.msk.mxu0 %vm104_vm0, %v96_v16  ;;  %867 = vmatprep.subr.msk.mxu1 %vm104_vm0, %v96_v16 }
  0x3d   :  { %779 = vmatpush3.xpose.msk.msra.mxu0 %vm104_vm0, %v80_v17  ;;  %883 = vmatpush3.xpose.msk.msra.mxu1 %vm104_vm0, %v80_v17 }
  0x3e   :  { %780 = vmatprep.subr.msk.mxu0 %vm104_vm0, %v95_v18  ;;  %868 = vmatprep.subr.msk.mxu1 %vm104_vm0, %v95_v18 }
  0x41   :  { %781 = vmatpush3.xpose.msk.msra.mxu0 %vm104_vm0, %v79_v19  ;;  %884 = vmatpush3.xpose.msk.msra.mxu1 %vm104_vm0, %v79_v19 }
  0x42   :  { %782 = vmatprep.subr.msk.mxu0 %vm104_vm0, %v94_v20  ;;  %869 = vmatprep.subr.msk.mxu1 %vm104_vm0, %v94_v20 }
  0x45   :  { %783 = vmatpush3.xpose.msk.msra.mxu0 %vm104_vm0, %v78_v21  ;;  %885 = vmatpush3.xpose.msk.msra.mxu1 %vm104_vm0, %v78_v21 }
  0x46   :  { %784 = vmatprep.subr.msk.mxu0 %vm104_vm0, %v93_v22  ;;  %870 = vmatprep.subr.msk.mxu1 %vm104_vm0, %v93_v22 }
  0x49   :  { %785 = vmatpush3.xpose.msk.msra.mxu0 %vm104_vm0, %v77_v23  ;;  %886 = vmatpush3.xpose.msk.msra.mxu1 %vm104_vm0, %v77_v23 }
  0x4a   :  { %786 = vmatprep.subr.msk.mxu0 %vm104_vm0, %v92_v24  ;;  %871 = vmatprep.subr.msk.mxu1 %vm104_vm0, %v92_v24 }
  0x4d   :  { %787 = vmatpush3.xpose.msk.msra.mxu0 %vm104_vm0, %v76_v25  ;;  %887 = vmatpush3.xpose.msk.msra.mxu1 %vm104_vm0, %v76_v25 }
  0x4e   :  { %788 = vmatprep.subr.msk.mxu0 %vm104_vm0, %v91_v26  ;;  %872 = vmatprep.subr.msk.mxu1 %vm104_vm0, %v91_v26 }
  0x51   :  { %789 = vmatpush3.xpose.msk.msra.mxu0 %vm104_vm0, %v75_v27  ;;  %888 = vmatpush3.xpose.msk.msra.mxu1 %vm104_vm0, %v75_v27 }
  0x52   :  { %790 = vmatprep.subr.msk.mxu0 %vm104_vm0, %v90_v28  ;;  %873 = vmatprep.subr.msk.mxu1 %vm104_vm0, %v90_v28 }
  0x55   :  { %791 = vmatpush3.xpose.msk.msra.mxu0 %vm104_vm0, %v74_v29  ;;  %889 = vmatpush3.xpose.msk.msra.mxu1 %vm104_vm0, %v74_v29 }
  0x56   :  { %792 = vmatprep.subr.msk.mxu0 %vm104_vm0, %v89_v30  ;;  %874 = vmatprep.subr.msk.mxu1 %vm104_vm0, %v89_v30 }
  0x59   :  { %793 = vmatpush3.xpose.msk.msra.mxu0 %vm104_vm0, %v73_v31  ;;  %890 = vmatpush3.xpose.msk.msra.mxu1 %vm104_vm0, %v73_v31 }
  0x5a   :  { %794 = vmatprep.subr.msk.mxu0 %vm104_vm0, %v88_v32  ;;  %875 = vmatprep.subr.msk.mxu1 %vm104_vm0, %v88_v32 }
  0x5d   :  { %795 = vmatpush3.xpose.msk.msra.mxu0 %vm104_vm0, %v72_v33  ;;  %891 = vmatpush3.xpose.msk.msra.mxu1 %vm104_vm0, %v72_v33 }
  0x60   :  { %797 = vmatmul.mubr.msk.f32.vlgmr.msra.gmra.mxu0 %vm104_vm0, %v1009_v7  ;;  %829 = vmatmul.mubr.msk.f32.vlgmr.msra.gmra.mxu1 %vm104_vm0, %v1013_v9 }
  0x61   :  { %798 = vmatprep.mubr.msk.f32.mxu0 %vm104_vm0, %v41_v34  ;;  %830 = vmatprep.mubr.msk.f32.mxu1 %vm104_vm0, %v57_v35 }
  0x64   :  { %799 = vmatmul.mubr.msk.f32.gmra.mxu0 %vm104_vm0, %v41_v34  ;;  %831 = vmatmul.mubr.msk.f32.gmra.mxu1 %vm104_vm0, %v57_v35 }
  0x65   :  { %800 = vmatprep.mubr.msk.f32.mxu0 %vm104_vm0, %v42_v36  ;;  %832 = vmatprep.mubr.msk.f32.mxu1 %vm104_vm0, %v58_v37 }
  0x68   :  { %801 = vmatmul.mubr.msk.f32.gmra.mxu0 %vm104_vm0, %v42_v36  ;;  %833 = vmatmul.mubr.msk.f32.gmra.mxu1 %vm104_vm0, %v58_v37 }
  0x69   :  { %802 = vmatprep.mubr.msk.f32.mxu0 %vm104_vm0, %v43_v38  ;;  %834 = vmatprep.mubr.msk.f32.mxu1 %vm104_vm0, %v59_v39 }
  0x6c   :  { %803 = vmatmul.mubr.msk.f32.gmra.mxu0 %vm104_vm0, %v43_v38  ;;  %835 = vmatmul.mubr.msk.f32.gmra.mxu1 %vm104_vm0, %v59_v39 }
  0x6d   :  { %804 = vmatprep.mubr.msk.f32.mxu0 %vm104_vm0, %v44_v40  ;;  %836 = vmatprep.mubr.msk.f32.mxu1 %vm104_vm0, %v60_v41 }
  0x70   :  { %805 = vmatmul.mubr.msk.f32.gmra.mxu0 %vm104_vm0, %v44_v40  ;;  %837 = vmatmul.mubr.msk.f32.gmra.mxu1 %vm104_vm0, %v60_v41 }
  0x71   :  { %806 = vmatprep.mubr.msk.f32.mxu0 %vm104_vm0, %v45_v42  ;;  %838 = vmatprep.mubr.msk.f32.mxu1 %vm104_vm0, %v61_v43 }
  0x74   :  { %807 = vmatmul.mubr.msk.f32.gmra.mxu0 %vm104_vm0, %v45_v42  ;;  %839 = vmatmul.mubr.msk.f32.gmra.mxu1 %vm104_vm0, %v61_v43 }
  0x75   :  { %808 = vmatprep.mubr.msk.f32.mxu0 %vm104_vm0, %v46_v44  ;;  %840 = vmatprep.mubr.msk.f32.mxu1 %vm104_vm0, %v62_v45 }
  0x78   :  { %809 = vmatmul.mubr.msk.f32.gmra.mxu0 %vm104_vm0, %v46_v44  ;;  %841 = vmatmul.mubr.msk.f32.gmra.mxu1 %vm104_vm0, %v62_v45 }
  0x79   :  { %810 = vmatprep.mubr.msk.f32.mxu0 %vm104_vm0, %v47_v46  ;;  %842 = vmatprep.mubr.msk.f32.mxu1 %vm104_vm0, %v63_v47 }
  0x7c   :  { %811 = vmatmul.mubr.msk.f32.gmra.mxu0 %vm104_vm0, %v47_v46  ;;  %843 = vmatmul.mubr.msk.f32.gmra.mxu1 %vm104_vm0, %v63_v47 }
  0x7d   :  { %812 = vmatprep.mubr.msk.f32.mxu0 %vm104_vm0, %v48_v48  ;;  %844 = vmatprep.mubr.msk.f32.mxu1 %vm104_vm0, %v64_v49 }
  0x80   :  { %813 = vmatmul.mubr.msk.f32.gmra.mxu0 %vm104_vm0, %v48_v48  ;;  %845 = vmatmul.mubr.msk.f32.gmra.mxu1 %vm104_vm0, %v64_v49 }
  0x81   :  { %814 = vmatprep.mubr.msk.f32.mxu0 %vm104_vm0, %v49_v50  ;;  %846 = vmatprep.mubr.msk.f32.mxu1 %vm104_vm0, %v65_v51 }
  0x84   :  { %815 = vmatmul.mubr.msk.f32.gmra.mxu0 %vm104_vm0, %v49_v50  ;;  %847 = vmatmul.mubr.msk.f32.gmra.mxu1 %vm104_vm0, %v65_v51 }
  0x85   :  { %816 = vmatprep.mubr.msk.f32.mxu0 %vm104_vm0, %v50_v52  ;;  %848 = vmatprep.mubr.msk.f32.mxu1 %vm104_vm0, %v66_v53 }
  0x88   :  { %817 = vmatmul.mubr.msk.f32.gmra.mxu0 %vm104_vm0, %v50_v52  ;;  %849 = vmatmul.mubr.msk.f32.gmra.mxu1 %vm104_vm0, %v66_v53 }
  0x89   :  { %818 = vmatprep.mubr.msk.f32.mxu0 %vm104_vm0, %v51_v54  ;;  %850 = vmatprep.mubr.msk.f32.mxu1 %vm104_vm0, %v67_v55 }
  0x8c   :  { %819 = vmatmul.mubr.msk.f32.gmra.mxu0 %vm104_vm0, %v51_v54  ;;  %851 = vmatmul.mubr.msk.f32.gmra.mxu1 %vm104_vm0, %v67_v55 }
  0x8d   :  { %820 = vmatprep.mubr.msk.f32.mxu0 %vm104_vm0, %v52_v56  ;;  %852 = vmatprep.mubr.msk.f32.mxu1 %vm104_vm0, %v68_v57 }
  0x90   :  { %821 = vmatmul.mubr.msk.f32.gmra.mxu0 %vm104_vm0, %v52_v56  ;;  %853 = vmatmul.mubr.msk.f32.gmra.mxu1 %vm104_vm0, %v68_v57 }
  0x91   :  { %822 = vmatprep.mubr.msk.f32.mxu0 %vm104_vm0, %v53_v58  ;;  %854 = vmatprep.mubr.msk.f32.mxu1 %vm104_vm0, %v69_v59 }
  0x94   :  { %823 = vmatmul.mubr.msk.f32.gmra.mxu0 %vm104_vm0, %v53_v58  ;;  %855 = vmatmul.mubr.msk.f32.gmra.mxu1 %vm104_vm0, %v69_v59 }
  0x95   :  { %824 = vmatprep.mubr.msk.f32.mxu0 %vm104_vm0, %v54_v60  ;;  %856 = vmatprep.mubr.msk.f32.mxu1 %vm104_vm0, %v70_v61 }
  0x98   :  { %825 = vmatmul.mubr.msk.f32.gmra.mxu0 %vm104_vm0, %v54_v60  ;;  %857 = vmatmul.mubr.msk.f32.gmra.mxu1 %vm104_vm0, %v70_v61 }
  0x99   :  { %826 = vmatprep.mubr.msk.f32.mxu0 %vm104_vm0, %v55_v62  ;;  %858 = vmatprep.mubr.msk.f32.mxu1 %vm104_vm0, %v71_v63 }
  0x9c   :  { %827 = vmatmul.mubr.msk.f32.gmra.mxu0 %vm104_vm0, %v55_v62  ;;  %859 = vmatmul.mubr.msk.f32.gmra.mxu1 %vm104_vm0, %v71_v63 }
 0x120   :  { %v363_v0 = vpop.f32.mrf.mxu0  ;;  %v459_v1 = vpop.f32.mrf.mxu1 }
 0x121   :  { %v554_v2 = vmax.f32 %v363_v0, 0.0  ;;  %v586_v3 = vmax.f32 %v459_v1, 0.0 }
 0x122   :  { %v365_v4 = vpop.f32.mrf.mxu0  ;;  %v461_v5 = vpop.f32.mrf.mxu1 }
 0x123   :  { %618 = vst [vmem:[#allocation7] sm:$0xff] %v554_v2  ;;  %650 = vst [vmem:[#allocation7 + $0x100] sm:$0xff] %v586_v3  ;;  %v555_v6 = vmax.f32 %v365_v4, 0.0  ;;  %v587_v7 = vmax.f32 %v461_v5, 0.0 }
 0x124   :  { %v369_v8 = vpop.f32.mrf.mxu0  ;;  %v465_v9 = vpop.f32.mrf.mxu1 }
 0x125   :  { %619 = vst [vmem:[#allocation7 + $0x8] sm:$0xff] %v555_v6  ;;  %651 = vst [vmem:[#allocation7 + $0x108] sm:$0xff] %v587_v7  ;;  %v556_v10 = vmax.f32 %v369_v8, 0.0  ;;  %v588_v11 = vmax.f32 %v465_v9, 0.0 }
 0x126   :  { %v371_v12 = vpop.f32.mrf.mxu0  ;;  %v467_v13 = vpop.f32.mrf.mxu1 }
 0x127   :  { %620 = vst [vmem:[#allocation7 + $0x10] sm:$0xff] %v556_v10  ;;  %652 = vst [vmem:[#allocation7 + $0x110] sm:$0xff] %v588_v11  ;;  %v557_v14 = vmax.f32 %v371_v12, 0.0  ;;  %v589_v15 = vmax.f32 %v467_v13, 0.0 }
 0x128   :  { %v375_v16 = vpop.f32.mrf.mxu0  ;;  %v471_v17 = vpop.f32.mrf.mxu1 }
 0x129   :  { %621 = vst [vmem:[#allocation7 + $0x18] sm:$0xff] %v557_v14  ;;  %653 = vst [vmem:[#allocation7 + $0x118] sm:$0xff] %v589_v15  ;;  %v558_v18 = vmax.f32 %v375_v16, 0.0  ;;  %v590_v19 = vmax.f32 %v471_v17, 0.0 }
 0x12a   :  { %v377_v20 = vpop.f32.mrf.mxu0  ;;  %v473_v21 = vpop.f32.mrf.mxu1 }
 0x12b   :  { %622 = vst [vmem:[#allocation7 + $0x20] sm:$0xff] %v558_v18  ;;  %654 = vst [vmem:[#allocation7 + $0x120] sm:$0xff] %v590_v19  ;;  %v559_v22 = vmax.f32 %v377_v20, 0.0  ;;  %v591_v23 = vmax.f32 %v473_v21, 0.0 }
 0x12c   :  { %v381_v24 = vpop.f32.mrf.mxu0  ;;  %v477_v25 = vpop.f32.mrf.mxu1 }
 0x12d   :  { %623 = vst [vmem:[#allocation7 + $0x28] sm:$0xff] %v559_v22  ;;  %655 = vst [vmem:[#allocation7 + $0x128] sm:$0xff] %v591_v23  ;;  %v560_v26 = vmax.f32 %v381_v24, 0.0  ;;  %v592_v27 = vmax.f32 %v477_v25, 0.0 }
 0x12e   :  { %v383_v28 = vpop.f32.mrf.mxu0  ;;  %v479_v29 = vpop.f32.mrf.mxu1 }
 0x12f   :  { %624 = vst [vmem:[#allocation7 + $0x30] sm:$0xff] %v560_v26  ;;  %656 = vst [vmem:[#allocation7 + $0x130] sm:$0xff] %v592_v27  ;;  %v561_v30 = vmax.f32 %v383_v28, 0.0  ;;  %v593_v31 = vmax.f32 %v479_v29, 0.0 }
 0x130   :  { %v387_v32 = vpop.f32.mrf.mxu0  ;;  %v483_v33 = vpop.f32.mrf.mxu1 }
 0x131   :  { %625 = vst [vmem:[#allocation7 + $0x38] sm:$0xff] %v561_v30  ;;  %657 = vst [vmem:[#allocation7 + $0x138] sm:$0xff] %v593_v31  ;;  %v562_v34 = vmax.f32 %v387_v32, 0.0  ;;  %v594_v35 = vmax.f32 %v483_v33, 0.0 }
 0x132   :  { %v389_v36 = vpop.f32.mrf.mxu0  ;;  %v485_v37 = vpop.f32.mrf.mxu1 }
 0x133   :  { %626 = vst [vmem:[#allocation7 + $0x40] sm:$0xff] %v562_v34  ;;  %658 = vst [vmem:[#allocation7 + $0x140] sm:$0xff] %v594_v35  ;;  %v563_v38 = vmax.f32 %v389_v36, 0.0  ;;  %v595_v39 = vmax.f32 %v485_v37, 0.0 }
 0x134   :  { %v393_v40 = vpop.f32.mrf.mxu0  ;;  %v489_v41 = vpop.f32.mrf.mxu1 }
 0x135   :  { %627 = vst [vmem:[#allocation7 + $0x48] sm:$0xff] %v563_v38  ;;  %659 = vst [vmem:[#allocation7 + $0x148] sm:$0xff] %v595_v39  ;;  %v564_v42 = vmax.f32 %v393_v40, 0.0  ;;  %v596_v43 = vmax.f32 %v489_v41, 0.0 }
 0x136   :  { %v395_v44 = vpop.f32.mrf.mxu0  ;;  %v491_v45 = vpop.f32.mrf.mxu1 }
 0x137   :  { %628 = vst [vmem:[#allocation7 + $0x50] sm:$0xff] %v564_v42  ;;  %660 = vst [vmem:[#allocation7 + $0x150] sm:$0xff] %v596_v43  ;;  %v565_v46 = vmax.f32 %v395_v44, 0.0  ;;  %v597_v47 = vmax.f32 %v491_v45, 0.0 }
 0x138   :  { %v399_v48 = vpop.f32.mrf.mxu0  ;;  %v495_v49 = vpop.f32.mrf.mxu1 }
 0x139   :  { %629 = vst [vmem:[#allocation7 + $0x58] sm:$0xff] %v565_v46  ;;  %661 = vst [vmem:[#allocation7 + $0x158] sm:$0xff] %v597_v47  ;;  %v566_v50 = vmax.f32 %v399_v48, 0.0  ;;  %v598_v51 = vmax.f32 %v495_v49, 0.0 }
 0x13a   :  { %v401_v52 = vpop.f32.mrf.mxu0  ;;  %v497_v53 = vpop.f32.mrf.mxu1 }
 0x13b   :  { %630 = vst [vmem:[#allocation7 + $0x60] sm:$0xff] %v566_v50  ;;  %662 = vst [vmem:[#allocation7 + $0x160] sm:$0xff] %v598_v51  ;;  %v567_v54 = vmax.f32 %v401_v52, 0.0  ;;  %v599_v55 = vmax.f32 %v497_v53, 0.0 }
 0x13c   :  { %v405_v56 = vpop.f32.mrf.mxu0  ;;  %v501_v57 = vpop.f32.mrf.mxu1 }
 0x13d   :  { %631 = vst [vmem:[#allocation7 + $0x68] sm:$0xff] %v567_v54  ;;  %663 = vst [vmem:[#allocation7 + $0x168] sm:$0xff] %v599_v55  ;;  %v568_v58 = vmax.f32 %v405_v56, 0.0  ;;  %v600_v59 = vmax.f32 %v501_v57, 0.0 }
 0x13e   :  { %v407_v60 = vpop.f32.mrf.mxu0  ;;  %v503_v61 = vpop.f32.mrf.mxu1 }
 0x13f   :  { %632 = vst [vmem:[#allocation7 + $0x70] sm:$0xff] %v568_v58  ;;  %664 = vst [vmem:[#allocation7 + $0x170] sm:$0xff] %v600_v59  ;;  %v569_v62 = vmax.f32 %v407_v60, 0.0  ;;  %v601_v63 = vmax.f32 %v503_v61, 0.0 }
 0x140   :  { %v411_v0 = vpop.f32.mrf.mxu0  ;;  %v507_v1 = vpop.f32.mrf.mxu1 }
 0x141   :  { %633 = vst [vmem:[#allocation7 + $0x78] sm:$0xff] %v569_v62  ;;  %665 = vst [vmem:[#allocation7 + $0x178] sm:$0xff] %v601_v63  ;;  %v570_v2 = vmax.f32 %v411_v0, 0.0  ;;  %v602_v3 = vmax.f32 %v507_v1, 0.0 }
 0x142   :  { %v413_v4 = vpop.f32.mrf.mxu0  ;;  %v509_v5 = vpop.f32.mrf.mxu1 }
 0x143   :  { %634 = vst [vmem:[#allocation7 + $0x80] sm:$0xff] %v570_v2  ;;  %666 = vst [vmem:[#allocation7 + $0x180] sm:$0xff] %v602_v3  ;;  %v571_v6 = vmax.f32 %v413_v4, 0.0  ;;  %v603_v7 = vmax.f32 %v509_v5, 0.0 }
 0x144   :  { %v417_v8 = vpop.f32.mrf.mxu0  ;;  %v513_v9 = vpop.f32.mrf.mxu1 }
 0x145   :  { %635 = vst [vmem:[#allocation7 + $0x88] sm:$0xff] %v571_v6  ;;  %667 = vst [vmem:[#allocation7 + $0x188] sm:$0xff] %v603_v7  ;;  %v572_v10 = vmax.f32 %v417_v8, 0.0  ;;  %v604_v11 = vmax.f32 %v513_v9, 0.0 }
 0x146   :  { %v419_v12 = vpop.f32.mrf.mxu0  ;;  %v515_v13 = vpop.f32.mrf.mxu1 }
 0x147   :  { %636 = vst [vmem:[#allocation7 + $0x90] sm:$0xff] %v572_v10  ;;  %668 = vst [vmem:[#allocation7 + $0x190] sm:$0xff] %v604_v11  ;;  %v573_v14 = vmax.f32 %v419_v12, 0.0  ;;  %v605_v15 = vmax.f32 %v515_v13, 0.0 }
 0x148   :  { %v423_v16 = vpop.f32.mrf.mxu0  ;;  %v519_v17 = vpop.f32.mrf.mxu1 }
 0x149   :  { %637 = vst [vmem:[#allocation7 + $0x98] sm:$0xff] %v573_v14  ;;  %669 = vst [vmem:[#allocation7 + $0x198] sm:$0xff] %v605_v15  ;;  %v574_v18 = vmax.f32 %v423_v16, 0.0  ;;  %v606_v19 = vmax.f32 %v519_v17, 0.0 }
 0x14a   :  { %v425_v20 = vpop.f32.mrf.mxu0  ;;  %v521_v21 = vpop.f32.mrf.mxu1 }
 0x14b   :  { %638 = vst [vmem:[#allocation7 + $0xa0] sm:$0xff] %v574_v18  ;;  %670 = vst [vmem:[#allocation7 + $0x1a0] sm:$0xff] %v606_v19  ;;  %v575_v22 = vmax.f32 %v425_v20, 0.0  ;;  %v607_v23 = vmax.f32 %v521_v21, 0.0 }
 0x14c   :  { %v429_v24 = vpop.f32.mrf.mxu0  ;;  %v525_v25 = vpop.f32.mrf.mxu1 }
 0x14d   :  { %639 = vst [vmem:[#allocation7 + $0xa8] sm:$0xff] %v575_v22  ;;  %671 = vst [vmem:[#allocation7 + $0x1a8] sm:$0xff] %v607_v23  ;;  %v576_v26 = vmax.f32 %v429_v24, 0.0  ;;  %v608_v27 = vmax.f32 %v525_v25, 0.0 }
 0x14e   :  { %v431_v28 = vpop.f32.mrf.mxu0  ;;  %v527_v29 = vpop.f32.mrf.mxu1 }
 0x14f   :  { %640 = vst [vmem:[#allocation7 + $0xb0] sm:$0xff] %v576_v26  ;;  %672 = vst [vmem:[#allocation7 + $0x1b0] sm:$0xff] %v608_v27  ;;  %v577_v30 = vmax.f32 %v431_v28, 0.0  ;;  %v609_v31 = vmax.f32 %v527_v29, 0.0 }
 0x150   :  { %v435_v32 = vpop.f32.mrf.mxu0  ;;  %v531_v33 = vpop.f32.mrf.mxu1 }
 0x151   :  { %641 = vst [vmem:[#allocation7 + $0xb8] sm:$0xff] %v577_v30  ;;  %673 = vst [vmem:[#allocation7 + $0x1b8] sm:$0xff] %v609_v31  ;;  %v578_v34 = vmax.f32 %v435_v32, 0.0  ;;  %v610_v35 = vmax.f32 %v531_v33, 0.0 }
 0x152   :  { %v437_v36 = vpop.f32.mrf.mxu0  ;;  %v533_v37 = vpop.f32.mrf.mxu1 }
 0x153   :  { %642 = vst [vmem:[#allocation7 + $0xc0] sm:$0xff] %v578_v34  ;;  %674 = vst [vmem:[#allocation7 + $0x1c0] sm:$0xff] %v610_v35  ;;  %v579_v38 = vmax.f32 %v437_v36, 0.0  ;;  %v611_v39 = vmax.f32 %v533_v37, 0.0 }
 0x154   :  { %v441_v40 = vpop.f32.mrf.mxu0  ;;  %v537_v41 = vpop.f32.mrf.mxu1 }
 0x155   :  { %643 = vst [vmem:[#allocation7 + $0xc8] sm:$0xff] %v579_v38  ;;  %675 = vst [vmem:[#allocation7 + $0x1c8] sm:$0xff] %v611_v39  ;;  %v580_v42 = vmax.f32 %v441_v40, 0.0  ;;  %v612_v43 = vmax.f32 %v537_v41, 0.0 }
 0x156   :  { %v443_v44 = vpop.f32.mrf.mxu0  ;;  %v539_v45 = vpop.f32.mrf.mxu1 }
 0x157   :  { %644 = vst [vmem:[#allocation7 + $0xd0] sm:$0xff] %v580_v42  ;;  %676 = vst [vmem:[#allocation7 + $0x1d0] sm:$0xff] %v612_v43  ;;  %v581_v46 = vmax.f32 %v443_v44, 0.0  ;;  %v613_v47 = vmax.f32 %v539_v45, 0.0 }
 0x158   :  { %v447_v48 = vpop.f32.mrf.mxu0  ;;  %v543_v49 = vpop.f32.mrf.mxu1 }
 0x159   :  { %645 = vst [vmem:[#allocation7 + $0xd8] sm:$0xff] %v581_v46  ;;  %677 = vst [vmem:[#allocation7 + $0x1d8] sm:$0xff] %v613_v47  ;;  %v582_v50 = vmax.f32 %v447_v48, 0.0  ;;  %v614_v51 = vmax.f32 %v543_v49, 0.0 }
 0x15a   :  { %v449_v52 = vpop.f32.mrf.mxu0  ;;  %v545_v53 = vpop.f32.mrf.mxu1 }
 0x15b   :  { %646 = vst [vmem:[#allocation7 + $0xe0] sm:$0xff] %v582_v50  ;;  %678 = vst [vmem:[#allocation7 + $0x1e0] sm:$0xff] %v614_v51  ;;  %v583_v54 = vmax.f32 %v449_v52, 0.0  ;;  %v615_v55 = vmax.f32 %v545_v53, 0.0 }
 0x15c   :  { %v453_v56 = vpop.f32.mrf.mxu0  ;;  %v549_v57 = vpop.f32.mrf.mxu1 }
 0x15d   :  { %647 = vst [vmem:[#allocation7 + $0xe8] sm:$0xff] %v583_v54  ;;  %679 = vst [vmem:[#allocation7 + $0x1e8] sm:$0xff] %v615_v55  ;;  %v584_v58 = vmax.f32 %v453_v56, 0.0  ;;  %v616_v59 = vmax.f32 %v549_v57, 0.0 }
 0x15e   :  { %v455_v60 = vpop.f32.mrf.mxu0  ;;  %v551_v61 = vpop.f32.mrf.mxu1 }
 0x15f   :  { %648 = vst [vmem:[#allocation7 + $0xf0] sm:$0xff] %v584_v58  ;;  %680 = vst [vmem:[#allocation7 + $0x1f0] sm:$0xff] %v616_v59  ;;  %v585_v62 = vmax.f32 %v455_v60, 0.0  ;;  %v617_v63 = vmax.f32 %v551_v61, 0.0 }
 0x161   :  { %649 = vst [vmem:[#allocation7 + $0xf8] sm:$0xff] %v585_v62  ;;  %681 = vst [vmem:[#allocation7 + $0x1f8] sm:$0xff] %v617_v63 }
 0x162   :  { %686 = vsyncadd [#allocation4], 7936  ;;  %s968_s0 = smov [#allocation7]  }
 0x163   :  { %s687_s1 = sshll.u32 %s968_s0, 4  ;;  %s688_s1 = int_to_ptr.vmem [resolvable:$true] %s687_s1 }
 0x164   :  { %s938_s23 = scalar_lea.vmem %s688_s1, 256  ;;  %s942_s24 = scalar_lea.vmem %s688_s1, 8192 }
 0x165   :  { %p939_p10 = scmp.ne.s32.totalorder %s688_s1, %s938_s23  ;;  %p943_p11 = scmp.lt.s32.totalorder %s688_s1, %s688_s1 }
 0x166   :  { %p944_p12 = scmp.lt.s32.totalorder %s942_s24, %s938_s23 }
 0x168   :  { %p945_p13 = por %p944_p12, %p943_p11 }
 0x16a   :  { %p946_p0 = pnand %p945_p13, %p939_p10 }
 0x16c   :  { %949 = shalt.err (!%p946_p0)
}
 0x16d   :  { %s969_s25 = smov 256  }
 0x16e   :  { %693 = dma.vmem_to_hbm [thread:$0]  %s688_s1, 256, %s1140_s2, [#allocation4], %s969_s25, %s965_s13, %s966_s14  }
 0x16f   :  { %962 = dma.done.wait [#allocation4], 8192  }
 0x170   :  { %963 = vsyncadd [#allocation4], 4294959104 }
 0x171   :  { %697 = vsyncpa [#allocation3], 1 }
 0x172   :  { %698 = vsyncpa [#allocation6], 1 }
 0x173   :  { %699 = vsyncpa [#allocation4], 1 }

</bundles_post_ra>
